<compile_context>
chip_gen: v5e
topology: v5e:2x2
jax: 0.10.0
libtpu: 0.0.40
codegen_flags: <defaults>
</compile_context>

<pallas_src>
import functools

import jax
import jax.numpy as jnp
from jax.experimental import pallas as pl
from jax.experimental.pallas import tpu as pltpu

_LANE = 128
_SUBLANE = 8


def _round_up(x, m):
    return -(-x // m) * m


# ---------------------------------------------------------------------------
# Kernel
# ---------------------------------------------------------------------------
def _discriminator_kernel(num_layers, negative_slope, use_sigmoid,
                          in_feat, k_tile, *refs):
    """Fused MLP forward for one (batch tile, K tile) grid step.

    refs = (x_ref,                          # (tile_b, k_tile)   bf16
            w0_ref, b0_ref, ..., wN_ref, bN_ref,   # (in,out) bf16 / (1,out) f32
            o_ref,                          # (tile_b, out_pad)  f32
            acc_ref)                        # (tile_b, h0)       f32 scratch

    Layer 0 is K-tiled (grid axis 1, "arbitrary") and accumulated into
    acc_ref; the remaining layers + optional sigmoid run on the last K step.
    """
    x_ref = refs[0]
    o_ref = refs[-2]
    acc_ref = refs[-1]
    p = refs[1:-2]

    k = pl.program_id(1)
    num_k = pl.num_programs(1)

    @pl.when(k == 0)
    def _():
        acc_ref[...] = jnp.zeros_like(acc_ref)

    x_tile = x_ref[...]                                    # bf16
    if in_feat % k_tile != 0:
        # Ragged last K block: zero the out-of-range feature columns so the
        # (zero-padded) layer-0 weight rows contribute exactly nothing.
        col = jax.lax.broadcasted_iota(jnp.int32, x_tile.shape, 1) + k * k_tile
        x_tile = jnp.where(col < in_feat, x_tile, jnp.zeros_like(x_tile))

    acc_ref[...] += jnp.dot(x_tile, p[0][...],
                            preferred_element_type=jnp.float32)

    @pl.when(k == num_k - 1)
    def _():
        h = acc_ref[...] + p[1][...]                       # layer-0 bias (f32)
        for i in range(1, num_layers):
            # LeakyReLU after the previous (hidden) layer, then next Linear.
            h = jnp.maximum(h, negative_slope * h)
            h = jnp.dot(h.astype(jnp.bfloat16), p[2 * i][...],
                        preferred_element_type=jnp.float32) + p[2 * i + 1][...]
        if use_sigmoid:
            h = jax.nn.sigmoid(h)
        o_ref[...] = h.astype(o_ref.dtype)


# ---------------------------------------------------------------------------
# Wrapper (one-time weight prep + forward)
# ---------------------------------------------------------------------------
def make_discriminator(params, *, negative_slope, use_sigmoid=True,
                       batch_tile=512, k_tile=None):
    """params: list of (weight, bias) pairs (PyTorch nn.Linear convention:
    weight (out,in), bias (out,)).  Last pair is out_fc.

    Does the one-time weight preparation and returns forward(x) -> (N, out).
    """
    num_layers = len(params)
    assert num_layers >= 1
    in_feat = params[0][0].shape[1]
    out_size = params[-1][0].shape[0]
    out_pad = _round_up(max(out_size, 1), _LANE)
    tile_cap = _round_up(max(batch_tile, _SUBLANE), _SUBLANE)

    # ----- choose the layer-0 K tile (static; weights padded to it once) ----
    if k_tile is None:
        budget = 8 * 1024 * 1024          # target for the double-buffered x tile
        if 2 * tile_cap * in_feat * 2 <= budget:
            k_tile = in_feat
        else:
            k_tile = max(_LANE, (budget // (4 * tile_cap)) // _LANE * _LANE)
            k_tile = min(k_tile, _round_up(in_feat, _LANE))
    if k_tile != in_feat:
        if k_tile % _LANE != 0:
            raise ValueError("k_tile must equal in_feat or be a multiple of 128")
        k_tile = min(k_tile, _round_up(in_feat, _LANE))
    k_pad = _round_up(in_feat, k_tile)
    num_k = k_pad // k_tile

    # ----- one-time weight prep: transpose, bf16 cast, zero padding ---------
    prepped = []
    for idx, (w, b) in enumerate(params):
        wt = jnp.asarray(w, jnp.float32).T.astype(jnp.bfloat16)   # (in, out)
        bb = jnp.asarray(b, jnp.float32).reshape(1, -1)            # (1, out)
        if idx == 0 and k_pad != in_feat:
            wt = jnp.pad(wt, ((0, k_pad - in_feat), (0, 0)))       # zero K rows
        if idx == num_layers - 1 and out_pad != out_size:
            wt = jnp.pad(wt, ((0, 0), (0, out_pad - out_size)))    # lane-dense out
            bb = jnp.pad(bb, ((0, 0), (0, out_pad - out_size)))
        prepped.append((wt, bb))
    flat_params = [a for pair in prepped for a in pair]
    h0 = prepped[0][0].shape[1]

    kernel = functools.partial(_discriminator_kernel, num_layers,
                               float(negative_slope), bool(use_sigmoid),
                               in_feat, k_tile)

    try:
        vmem_cap = int(pltpu.get_tpu_info().vmem_capacity_bytes)
    except Exception:
        vmem_cap = 64 * 1024 * 1024

    def forward(x):
        batch = x.shape[0]
        x2 = x.reshape(batch, -1).astype(jnp.bfloat16)    # torch .flatten(1,-1)
        assert x2.shape[1] == in_feat, (x2.shape, in_feat)

        # Batch tile: multiple of 8 (or the whole batch), capped so the
        # "parallel" axis has >= 2 steps when possible (v7x megacore).
        if batch <= _SUBLANE:
            tile_b = batch
        else:
            tile_b = min(tile_cap, _round_up(pl.cdiv(batch, 2), _SUBLANE))
        num_b = pl.cdiv(batch, tile_b)

        # Conservative VMEM estimate (count everything as double-buffered).
        est = 2 * tile_b * k_tile * 2                               # x tiles
        est += 2 * k_tile * h0 * 2                                  # w0 tile(s)
        est += 2 * prepped[0][1].size * 4                           # b0
        est += 2 * sum(w.size * 2 + b.size * 4 for w, b in prepped[1:])
        est += 2 * tile_b * out_pad * 4                             # out tiles
        est += tile_b * h0 * 4                                      # accumulator
        est += 2 * tile_b * max(w.shape[1] for w, _ in prepped) * 4  # live acts
        vmem_limit = int(min(max(2 * est, 32 * 1024 * 1024), (vmem_cap * 3) // 4))

        def call(single_buffer_resident):
            def resident_spec(shape):
                if single_buffer_resident:
                    return pl.BlockSpec(shape, lambda i, k: (0, 0),
                                        pipeline_mode=pl.Buffered(1))
                return pl.BlockSpec(shape, lambda i, k: (0, 0))

            in_specs = [pl.BlockSpec((tile_b, k_tile), lambda i, k: (i, k))]
            w0, b0 = prepped[0]
            if num_k == 1:
                in_specs.append(resident_spec(w0.shape))
            else:
                in_specs.append(pl.BlockSpec((k_tile, h0), lambda i, k: (k, 0)))
            in_specs.append(resident_spec(b0.shape))
            for w, b in prepped[1:]:
                in_specs.append(resident_spec(w.shape))
                in_specs.append(resident_spec(b.shape))

            return pl.pallas_call(
                kernel,
                grid=(num_b, num_k),
                out_shape=jax.ShapeDtypeStruct((batch, out_pad), jnp.float32),
                in_specs=in_specs,
                out_specs=pl.BlockSpec((tile_b, out_pad), lambda i, k: (i, 0)),
                scratch_shapes=[pltpu.VMEM((tile_b, h0), jnp.float32)],
                compiler_params=pltpu.CompilerParams(
                    dimension_semantics=("parallel", "arbitrary"),
                    vmem_limit_bytes=vmem_limit,
                ),
            )(x2, *flat_params)

        try:
            out = call(True)
        except Exception:
            # Fallback: installed JAX may reject single-buffered block specs.
            out = call(False)

        return out[:, :out_size]

    return forward


# ---------------------------------------------------------------------------
# Deterministic init + pure-JAX reference
# ---------------------------------------------------------------------------
def init_params(key, hidden_channels, out_size):
    """nn.Linear-style init: U(-1/sqrt(fan_in), 1/sqrt(fan_in))."""
    dims = list(hidden_channels) + [out_size]
    params = []
    for i in range(len(dims) - 1):
        fan_in, fan_out = dims[i], dims[i + 1]
        key, kw, kb = jax.random.split(key, 3)
        bound = 1.0 / (fan_in ** 0.5)
        w = jax.random.uniform(kw, (fan_out, fan_in), jnp.float32,
                               minval=-bound, maxval=bound)
        b = jax.random.uniform(kb, (fan_out,), jnp.float32,
                               minval=-bound, maxval=bound)
        params.append((w, b))
    return params


def reference_forward(x, params, *, negative_slope, use_sigmoid):
    """Pure-JAX f32 reference matching the PyTorch module."""
    h = x.reshape(x.shape[0], -1).astype(jnp.float32)
    for w, b in params[:-1]:
        h = h @ w.T + b
        h = jnp.where(h >= 0, h, negative_slope * h)
    w, b = params[-1]
    h = h @ w.T + b
    if use_sigmoid:
        h = jax.nn.sigmoid(h)
    return h


if __name__ == "__main__":
    key = jax.random.PRNGKey(0)

    # (N, C, H, W) flattened to hidden_channels[0] = C*H*W features.
    batch, C, H, W = 2, 4, 16, 16
    hidden_channels = [C * H * W, 64, 32]       # 1024 -> 64 -> 32 -> 1
    negative_slope = 0.2
    out_size = 1
    use_sigmoid = True

    key, kx = jax.random.split(key)
    x = jax.random.normal(kx, (batch, C, H, W), jnp.float32)
    params = init_params(key, hidden_channels, out_size)

    fwd = make_discriminator(params, negative_slope=negative_slope,
                             use_sigmoid=use_sigmoid)
    out = jax.block_until_ready(fwd(x))
    ref = reference_forward(x, params, negative_slope=negative_slope,
                            use_sigmoid=use_sigmoid)
    assert out.shape == (batch, out_size), out.shape
    # bf16 matmuls (f32 accumulate) vs pure-f32 reference -> loosened tolerance.
    assert jnp.allclose(out, ref, atol=3e-2, rtol=3e-2), (out, ref)

    # Second check: exercises the K-tiled layer-0 path (ragged K tail with
    # in-kernel masking) and a ragged multi-tile batch (2 parallel grid steps).
    batch2 = 10
    key, kx2 = jax.random.split(key)
    x_big = jax.random.normal(kx2, (batch2, C, H, W), jnp.float32)
    fwd2 = make_discriminator(params, negative_slope=negative_slope,
                              use_sigmoid=use_sigmoid, k_tile=384)
    out2 = jax.block_until_ready(fwd2(x_big))
    ref2 = reference_forward(x_big, params, negative_slope=negative_slope,
                             use_sigmoid=use_sigmoid)
    assert out2.shape == (batch2, out_size), out2.shape
    assert jnp.allclose(out2, ref2, atol=3e-2, rtol=3e-2), (out2, ref2)

    print("KERNEL_OK")
</pallas_src>

<mosaic_0001>
module attributes {stable_mosaic.version = 11 : i64} {
  func.func @_discriminator_kernel(%arg0: i32, %arg1: i32, %arg2: memref<2x1024xbf16, #tpu.memory_space<vmem>>, %arg3: memref<1024x64xbf16, #tpu.memory_space<vmem>>, %arg4: memref<1x64xf32, #tpu.memory_space<vmem>>, %arg5: memref<64x32xbf16, #tpu.memory_space<vmem>>, %arg6: memref<1x32xf32, #tpu.memory_space<vmem>>, %arg7: memref<32x128xbf16, #tpu.memory_space<vmem>>, %arg8: memref<1x128xf32, #tpu.memory_space<vmem>>, %arg9: memref<2x128xf32, #tpu.memory_space<vmem>>, %arg10: memref<2x64xf32, #tpu.memory_space<vmem>>) attributes {dimension_semantics = [#tpu.dimension_semantics<parallel>, #tpu.dimension_semantics<arbitrary>], iteration_bounds = array<i64: 1, 1>, scalar_prefetch = 0 : i64, scratch_operands = 1 : i64, tpu.core_type = #tpu.core_type<tc>, window_params = [{transform_indices = @transform_0, window_bounds = array<i64: 2, 1024>}, {pipeline_mode = #tpu.pipeline_mode<synchronous>, transform_indices = @transform_1, window_bounds = array<i64: 1024, 64>}, {pipeline_mode = #tpu.pipeline_mode<synchronous>, transform_indices = @transform_2, window_bounds = array<i64: 1, 64>}, {pipeline_mode = #tpu.pipeline_mode<synchronous>, transform_indices = @transform_3, window_bounds = array<i64: 64, 32>}, {pipeline_mode = #tpu.pipeline_mode<synchronous>, transform_indices = @transform_4, window_bounds = array<i64: 1, 32>}, {pipeline_mode = #tpu.pipeline_mode<synchronous>, transform_indices = @transform_5, window_bounds = array<i64: 32, 128>}, {pipeline_mode = #tpu.pipeline_mode<synchronous>, transform_indices = @transform_6, window_bounds = array<i64: 1, 128>}, {transform_indices = @transform_7, window_bounds = array<i64: 2, 128>}]} {
    %c0_i32 = arith.constant 0 : i32
    %0 = arith.cmpi eq, %arg1, %c0_i32 : i32
    %1 = arith.extui %0 : i1 to i32
    %c0_i32_0 = arith.constant 0 : i32
    %2 = arith.cmpi ne, %1, %c0_i32_0 : i32
    scf.if %2 {
      %cst_10 = arith.constant 0.000000e+00 : f32
      %12 = vector.broadcast %cst_10 : f32 to vector<2x64xf32>
      %c0_11 = arith.constant 0 : index
      %c0_12 = arith.constant 0 : index
      %13 = vector.load %arg10[%c0_11, %c0_12] : memref<2x64xf32, #tpu.memory_space<vmem>>, vector<2x64xf32>
      tpu.vector_store %arg10[%c0_11, %c0_12], %12 {strides = array<i32>} : memref<2x64xf32, #tpu.memory_space<vmem>>, vector<2x64xf32>,
    } else {
    }
    %c0 = arith.constant 0 : index
    %c0_1 = arith.constant 0 : index
    %3 = vector.load %arg2[%c0, %c0_1] : memref<2x1024xbf16, #tpu.memory_space<vmem>>, vector<2x1024xbf16>
    %c0_2 = arith.constant 0 : index
    %c0_3 = arith.constant 0 : index
    %4 = vector.load %arg10[%c0_2, %c0_3] : memref<2x64xf32, #tpu.memory_space<vmem>>, vector<2x64xf32>
    %c0_4 = arith.constant 0 : index
    %c0_5 = arith.constant 0 : index
    %5 = vector.load %arg3[%c0_4, %c0_5] : memref<1024x64xbf16, #tpu.memory_space<vmem>>, vector<1024x64xbf16>
    %cst = arith.constant dense<0.000000e+00> : vector<2x64xf32>
    %6 = tpu.matmul %3, %5, %cst {dimension_numbers = #tpu.dot_dimension_numbers<[1], [0], [0], [1], [0, 0, 1, 1], [], []>} : vector<2x1024xbf16>, vector<1024x64xbf16>, vector<2x64xf32> -> vector<2x64xf32>
    %7 = arith.addf %4, %6 : vector<2x64xf32>
    %c0_6 = arith.constant 0 : index
    %c0_7 = arith.constant 0 : index
    %8 = vector.load %arg10[%c0_6, %c0_7] : memref<2x64xf32, #tpu.memory_space<vmem>>, vector<2x64xf32>
    tpu.vector_store %arg10[%c0_6, %c0_7], %7 {strides = array<i32>} : memref<2x64xf32, #tpu.memory_space<vmem>>, vector<2x64xf32>,
    %c0_i32_8 = arith.constant 0 : i32
    %9 = arith.cmpi eq, %arg1, %c0_i32_8 : i32
    %10 = arith.extui %9 : i1 to i32
    %c0_i32_9 = arith.constant 0 : i32
    %11 = arith.cmpi ne, %10, %c0_i32_9 : i32
    scf.if %11 {
      %c0_10 = arith.constant 0 : index
      %c0_11 = arith.constant 0 : index
      %12 = vector.load %arg10[%c0_10, %c0_11] : memref<2x64xf32, #tpu.memory_space<vmem>>, vector<2x64xf32>
      %c0_12 = arith.constant 0 : index
      %c0_13 = arith.constant 0 : index
      %13 = vector.load %arg4[%c0_12, %c0_13] : memref<1x64xf32, #tpu.memory_space<vmem>>, vector<1x64xf32>
      %14 = vector.broadcast %13 : vector<1x64xf32> to vector<2x64xf32>
      %15 = arith.addf %12, %14 : vector<2x64xf32>
      %cst_14 = arith.constant 2.000000e-01 : f32
      %16 = vector.broadcast %cst_14 : f32 to vector<2x64xf32>
      %17 = arith.mulf %16, %15 : vector<2x64xf32>
      %18 = arith.maximumf %15, %17 : vector<2x64xf32>
      %19 = arith.truncf %18 : vector<2x64xf32> to vector<2x64xbf16>
      %c0_15 = arith.constant 0 : index
      %c0_16 = arith.constant 0 : index
      %20 = vector.load %arg5[%c0_15, %c0_16] : memref<64x32xbf16, #tpu.memory_space<vmem>>, vector<64x32xbf16>
      %cst_17 = arith.constant dense<0.000000e+00> : vector<2x32xf32>
      %21 = tpu.matmul %19, %20, %cst_17 {dimension_numbers = #tpu.dot_dimension_numbers<[1], [0], [0], [1], [0, 0, 1, 1], [], []>} : vector<2x64xbf16>, vector<64x32xbf16>, vector<2x32xf32> -> vector<2x32xf32>
      %c0_18 = arith.constant 0 : index
      %c0_19 = arith.constant 0 : index
      %22 = vector.load %arg6[%c0_18, %c0_19] : memref<1x32xf32, #tpu.memory_space<vmem>>, vector<1x32xf32>
      %23 = vector.broadcast %22 : vector<1x32xf32> to vector<2x32xf32>
      %24 = arith.addf %21, %23 : vector<2x32xf32>
      %cst_20 = arith.constant 2.000000e-01 : f32
      %25 = vector.broadcast %cst_20 : f32 to vector<2x32xf32>
      %26 = arith.mulf %25, %24 : vector<2x32xf32>
      %27 = arith.maximumf %24, %26 : vector<2x32xf32>
      %28 = arith.truncf %27 : vector<2x32xf32> to vector<2x32xbf16>
      %c0_21 = arith.constant 0 : index
      %c0_22 = arith.constant 0 : index
      %29 = vector.load %arg7[%c0_21, %c0_22] : memref<32x128xbf16, #tpu.memory_space<vmem>>, vector<32x128xbf16>
      %cst_23 = arith.constant dense<0.000000e+00> : vector<2x128xf32>
      %30 = tpu.matmul %28, %29, %cst_23 {dimension_numbers = #tpu.dot_dimension_numbers<[1], [0], [0], [1], [0, 0, 1, 1], [], []>} : vector<2x32xbf16>, vector<32x128xbf16>, vector<2x128xf32> -> vector<2x128xf32>
      %c0_24 = arith.constant 0 : index
      %c0_25 = arith.constant 0 : index
      %31 = vector.load %arg8[%c0_24, %c0_25] : memref<1x128xf32, #tpu.memory_space<vmem>>, vector<1x128xf32>
      %32 = vector.broadcast %31 : vector<1x128xf32> to vector<2x128xf32>
      %33 = arith.addf %30, %32 : vector<2x128xf32>
      %34 = arith.negf %33 : vector<2x128xf32>
      %35 = math.exp %34 : vector<2x128xf32>
      %cst_26 = arith.constant 1.000000e+00 : f32
      %36 = vector.broadcast %cst_26 : f32 to vector<2x128xf32>
      %37 = arith.addf %36, %35 : vector<2x128xf32>
      %38 = arith.divf %36, %37 : vector<2x128xf32>
      %c0_27 = arith.constant 0 : index
      %c0_28 = arith.constant 0 : index
      %39 = vector.load %arg9[%c0_27, %c0_28] : memref<2x128xf32, #tpu.memory_space<vmem>>, vector<2x128xf32>
      tpu.vector_store %arg9[%c0_27, %c0_28], %38 {strides = array<i32>} : memref<2x128xf32, #tpu.memory_space<vmem>>, vector<2x128xf32>,
    } else {
    }
    return
  }
  func.func @transform_0(%arg0: i32, %arg1: i32) -> (i32, i32) {
    %c0_i32 = arith.constant 0 : i32
    return %arg0, %arg1 : i32, i32
  }
  func.func @transform_1(%arg0: i32, %arg1: i32) -> (i32, i32) {
    %c0_i32 = arith.constant 0 : i32
    %c0_i32_0 = arith.constant 0 : i32
    %c0_i32_1 = arith.constant 0 : i32
    return %c0_i32, %c0_i32_0 : i32, i32
  }
  func.func @transform_2(%arg0: i32, %arg1: i32) -> (i32, i32) {
    %c0_i32 = arith.constant 0 : i32
    %c0_i32_0 = arith.constant 0 : i32
    %c0_i32_1 = arith.constant 0 : i32
    return %c0_i32, %c0_i32_0 : i32, i32
  }
  func.func @transform_3(%arg0: i32, %arg1: i32) -> (i32, i32) {
    %c0_i32 = arith.constant 0 : i32
    %c0_i32_0 = arith.constant 0 : i32
    %c0_i32_1 = arith.constant 0 : i32
    return %c0_i32, %c0_i32_0 : i32, i32
  }
  func.func @transform_4(%arg0: i32, %arg1: i32) -> (i32, i32) {
    %c0_i32 = arith.constant 0 : i32
    %c0_i32_0 = arith.constant 0 : i32
    %c0_i32_1 = arith.constant 0 : i32
    return %c0_i32, %c0_i32_0 : i32, i32
  }
  func.func @transform_5(%arg0: i32, %arg1: i32) -> (i32, i32) {
    %c0_i32 = arith.constant 0 : i32
    %c0_i32_0 = arith.constant 0 : i32
    %c0_i32_1 = arith.constant 0 : i32
    return %c0_i32, %c0_i32_0 : i32, i32
  }
  func.func @transform_6(%arg0: i32, %arg1: i32) -> (i32, i32) {
    %c0_i32 = arith.constant 0 : i32
    %c0_i32_0 = arith.constant 0 : i32
    %c0_i32_1 = arith.constant 0 : i32
    return %c0_i32, %c0_i32_0 : i32, i32
  }
  func.func @transform_7(%arg0: i32, %arg1: i32) -> (i32, i32) {
    %c0_i32 = arith.constant 0 : i32
    %c0_i32_0 = arith.constant 0 : i32
    return %arg0, %c0_i32 : i32, i32
  }
}

module attributes {stable_mosaic.version = 11 : i64} {
  func.func @_discriminator_kernel(%arg0: i32, %arg1: i32, %arg2: memref<2x1024xbf16, #tpu.memory_space<vmem>>, %arg3: memref<1024x64xbf16, #tpu.memory_space<vmem>>, %arg4: memref<1x64xf32, #tpu.memory_space<vmem>>, %arg5: memref<64x32xbf16, #tpu.memory_space<vmem>>, %arg6: memref<1x32xf32, #tpu.memory_space<vmem>>, %arg7: memref<32x128xbf16, #tpu.memory_space<vmem>>, %arg8: memref<1x128xf32, #tpu.memory_space<vmem>>, %arg9: memref<2x128xf32, #tpu.memory_space<vmem>>, %arg10: memref<2x64xf32, #tpu.memory_space<vmem>>) attributes {dimension_semantics = [#tpu.dimension_semantics<parallel>, #tpu.dimension_semantics<arbitrary>], iteration_bounds = array<i64: 1, 1>, scalar_prefetch = 0 : i64, scratch_operands = 1 : i64, tpu.core_type = #tpu.core_type<tc>, window_params = [{transform_indices = @transform_0, window_bounds = array<i64: 2, 1024>}, {pipeline_mode = #tpu.pipeline_mode<synchronous>, transform_indices = @transform_1, window_bounds = array<i64: 1024, 64>}, {pipeline_mode = #tpu.pipeline_mode<synchronous>, transform_indices = @transform_2, window_bounds = array<i64: 1, 64>}, {pipeline_mode = #tpu.pipeline_mode<synchronous>, transform_indices = @transform_3, window_bounds = array<i64: 64, 32>}, {pipeline_mode = #tpu.pipeline_mode<synchronous>, transform_indices = @transform_4, window_bounds = array<i64: 1, 32>}, {pipeline_mode = #tpu.pipeline_mode<synchronous>, transform_indices = @transform_5, window_bounds = array<i64: 32, 128>}, {pipeline_mode = #tpu.pipeline_mode<synchronous>, transform_indices = @transform_6, window_bounds = array<i64: 1, 128>}, {transform_indices = @transform_7, window_bounds = array<i64: 2, 128>}]} {
    %c0_i32 = arith.constant 0 : i32
    %0 = arith.cmpi eq, %arg1, %c0_i32 : i32
    %1 = arith.extui %0 : i1 to i32
    %c0_i32_0 = arith.constant 0 : i32
    %2 = arith.cmpi ne, %1, %c0_i32_0 : i32
    scf.if %2 {
      %cst_10 = arith.constant 0.000000e+00 : f32
      %12 = vector.broadcast %cst_10 : f32 to vector<2x64xf32>
      %c0_11 = arith.constant 0 : index
      %c0_12 = arith.constant 0 : index
      %13 = vector.load %arg10[%c0_11, %c0_12] : memref<2x64xf32, #tpu.memory_space<vmem>>, vector<2x64xf32>
      tpu.vector_store %arg10[%c0_11, %c0_12], %12 {strides = array<i32>} : memref<2x64xf32, #tpu.memory_space<vmem>>, vector<2x64xf32>,
    } else {
    }
    %c0 = arith.constant 0 : index
    %c0_1 = arith.constant 0 : index
    %3 = vector.load %arg2[%c0, %c0_1] : memref<2x1024xbf16, #tpu.memory_space<vmem>>, vector<2x1024xbf16>
    %c0_2 = arith.constant 0 : index
    %c0_3 = arith.constant 0 : index
    %4 = vector.load %arg10[%c0_2, %c0_3] : memref<2x64xf32, #tpu.memory_space<vmem>>, vector<2x64xf32>
    %c0_4 = arith.constant 0 : index
    %c0_5 = arith.constant 0 : index
    %5 = vector.load %arg3[%c0_4, %c0_5] : memref<1024x64xbf16, #tpu.memory_space<vmem>>, vector<1024x64xbf16>
    %cst = arith.constant dense<0.000000e+00> : vector<2x64xf32>
    %6 = tpu.matmul %3, %5, %cst {dimension_numbers = #tpu.dot_dimension_numbers<[1], [0], [0], [1], [0, 0, 1, 1], [], []>} : vector<2x1024xbf16>, vector<1024x64xbf16>, vector<2x64xf32> -> vector<2x64xf32>
    %7 = arith.addf %4, %6 : vector<2x64xf32>
    %c0_6 = arith.constant 0 : index
    %c0_7 = arith.constant 0 : index
    %8 = vector.load %arg10[%c0_6, %c0_7] : memref<2x64xf32, #tpu.memory_space<vmem>>, vector<2x64xf32>
    tpu.vector_store %arg10[%c0_6, %c0_7], %7 {strides = array<i32>} : memref<2x64xf32, #tpu.memory_space<vmem>>, vector<2x64xf32>,
    %c0_i32_8 = arith.constant 0 : i32
    %9 = arith.cmpi eq, %arg1, %c0_i32_8 : i32
    %10 = arith.extui %9 : i1 to i32
    %c0_i32_9 = arith.constant 0 : i32
    %11 = arith.cmpi ne, %10, %c0_i32_9 : i32
    scf.if %11 {
      %c0_10 = arith.constant 0 : index
      %c0_11 = arith.constant 0 : index
      %12 = vector.load %arg10[%c0_10, %c0_11] : memref<2x64xf32, #tpu.memory_space<vmem>>, vector<2x64xf32>
      %c0_12 = arith.constant 0 : index
      %c0_13 = arith.constant 0 : index
      %13 = vector.load %arg4[%c0_12, %c0_13] : memref<1x64xf32, #tpu.memory_space<vmem>>, vector<1x64xf32>
      %14 = vector.broadcast %13 : vector<1x64xf32> to vector<2x64xf32>
      %15 = arith.addf %12, %14 : vector<2x64xf32>
      %cst_14 = arith.constant 2.000000e-01 : f32
      %16 = vector.broadcast %cst_14 : f32 to vector<2x64xf32>
      %17 = arith.mulf %16, %15 : vector<2x64xf32>
      %18 = arith.maximumf %15, %17 : vector<2x64xf32>
      %19 = arith.truncf %18 : vector<2x64xf32> to vector<2x64xbf16>
      %c0_15 = arith.constant 0 : index
      %c0_16 = arith.constant 0 : index
      %20 = vector.load %arg5[%c0_15, %c0_16] : memref<64x32xbf16, #tpu.memory_space<vmem>>, vector<64x32xbf16>
      %cst_17 = arith.constant dense<0.000000e+00> : vector<2x32xf32>
      %21 = tpu.matmul %19, %20, %cst_17 {dimension_numbers = #tpu.dot_dimension_numbers<[1], [0], [0], [1], [0, 0, 1, 1], [], []>} : vector<2x64xbf16>, vector<64x32xbf16>, vector<2x32xf32> -> vector<2x32xf32>
      %c0_18 = arith.constant 0 : index
      %c0_19 = arith.constant 0 : index
      %22 = vector.load %arg6[%c0_18, %c0_19] : memref<1x32xf32, #tpu.memory_space<vmem>>, vector<1x32xf32>
      %23 = vector.broadcast %22 : vector<1x32xf32> to vector<2x32xf32>
      %24 = arith.addf %21, %23 : vector<2x32xf32>
      %cst_20 = arith.constant 2.000000e-01 : f32
      %25 = vector.broadcast %cst_20 : f32 to vector<2x32xf32>
      %26 = arith.mulf %25, %24 : vector<2x32xf32>
      %27 = arith.maximumf %24, %26 : vector<2x32xf32>
      %28 = arith.truncf %27 : vector<2x32xf32> to vector<2x32xbf16>
      %c0_21 = arith.constant 0 : index
      %c0_22 = arith.constant 0 : index
      %29 = vector.load %arg7[%c0_21, %c0_22] : memref<32x128xbf16, #tpu.memory_space<vmem>>, vector<32x128xbf16>
      %cst_23 = arith.constant dense<0.000000e+00> : vector<2x128xf32>
      %30 = tpu.matmul %28, %29, %cst_23 {dimension_numbers = #tpu.dot_dimension_numbers<[1], [0], [0], [1], [0, 0, 1, 1], [], []>} : vector<2x32xbf16>, vector<32x128xbf16>, vector<2x128xf32> -> vector<2x128xf32>
      %c0_24 = arith.constant 0 : index
      %c0_25 = arith.constant 0 : index
      %31 = vector.load %arg8[%c0_24, %c0_25] : memref<1x128xf32, #tpu.memory_space<vmem>>, vector<1x128xf32>
      %32 = vector.broadcast %31 : vector<1x128xf32> to vector<2x128xf32>
      %33 = arith.addf %30, %32 : vector<2x128xf32>
      %34 = arith.negf %33 : vector<2x128xf32>
      %35 = math.exp %34 : vector<2x128xf32>
      %cst_26 = arith.constant 1.000000e+00 : f32
      %36 = vector.broadcast %cst_26 : f32 to vector<2x128xf32>
      %37 = arith.addf %36, %35 : vector<2x128xf32>
      %38 = arith.divf %36, %37 : vector<2x128xf32>
      %c0_27 = arith.constant 0 : index
      %c0_28 = arith.constant 0 : index
      %39 = vector.load %arg9[%c0_27, %c0_28] : memref<2x128xf32, #tpu.memory_space<vmem>>, vector<2x128xf32>
      tpu.vector_store %arg9[%c0_27, %c0_28], %38 {strides = array<i32>} : memref<2x128xf32, #tpu.memory_space<vmem>>, vector<2x128xf32>,
    } else {
    }
    return
  }
  func.func @transform_0(%arg0: i32, %arg1: i32) -> (i32, i32) {
    %c0_i32 = arith.constant 0 : i32
    return %arg0, %arg1 : i32, i32
  }
  func.func @transform_1(%arg0: i32, %arg1: i32) -> (i32, i32) {
    %c0_i32 = arith.constant 0 : i32
    %c0_i32_0 = arith.constant 0 : i32
    %c0_i32_1 = arith.constant 0 : i32
    return %c0_i32, %c0_i32_0 : i32, i32
  }
  func.func @transform_2(%arg0: i32, %arg1: i32) -> (i32, i32) {
    %c0_i32 = arith.constant 0 : i32
    %c0_i32_0 = arith.constant 0 : i32
    %c0_i32_1 = arith.constant 0 : i32
    return %c0_i32, %c0_i32_0 : i32, i32
  }
  func.func @transform_3(%arg0: i32, %arg1: i32) -> (i32, i32) {
    %c0_i32 = arith.constant 0 : i32
    %c0_i32_0 = arith.constant 0 : i32
    %c0_i32_1 = arith.constant 0 : i32
    return %c0_i32, %c0_i32_0 : i32, i32
  }
  func.func @transform_4(%arg0: i32, %arg1: i32) -> (i32, i32) {
    %c0_i32 = arith.constant 0 : i32
    %c0_i32_0 = arith.constant 0 : i32
    %c0_i32_1 = arith.constant 0 : i32
    return %c0_i32, %c0_i32_0 : i32, i32
  }
  func.func @transform_5(%arg0: i32, %arg1: i32) -> (i32, i32) {
    %c0_i32 = arith.constant 0 : i32
    %c0_i32_0 = arith.constant 0 : i32
    %c0_i32_1 = arith.constant 0 : i32
    return %c0_i32, %c0_i32_0 : i32, i32
  }
  func.func @transform_6(%arg0: i32, %arg1: i32) -> (i32, i32) {
    %c0_i32 = arith.constant 0 : i32
    %c0_i32_0 = arith.constant 0 : i32
    %c0_i32_1 = arith.constant 0 : i32
    return %c0_i32, %c0_i32_0 : i32, i32
  }
  func.func @transform_7(%arg0: i32, %arg1: i32) -> (i32, i32) {
    %c0_i32 = arith.constant 0 : i32
    %c0_i32_0 = arith.constant 0 : i32
    return %arg0, %c0_i32 : i32, i32
  }
}

</mosaic_0001>

<bundles_post_ra>
// kernel: tpu_custom_call.1
= control target key start
LH: loop header
LB: loop body
LE: loop exit
PB: predicated region body
PF: predicated region fallthrough
CT: control target
= control target key end

     0   :  { %s1471_s0 = inlined_call_operand.vmem [shape: bf16[2,1024], index: 0, kind: input, shape index: {}]   ;;  %s1472_s1 = inlined_call_operand.vmem [shape: bf16[1024,64], index: 1, kind: input, shape index: {}]   ;;  %s1473_s2 = inlined_call_operand.vmem [shape: f32[1,64], index: 2, kind: input, shape index: {}]   ;;  %s1474_s3 = inlined_call_operand.vmem [shape: bf16[64,32], index: 3, kind: input, shape index: {}]   ;;  %s1475_s4 = inlined_call_operand.vmem [shape: f32[1,32], index: 4, kind: input, shape index: {}]   ;;  %s1476_s5 = inlined_call_operand.vmem [shape: bf16[32,128], index: 5, kind: input, shape index: {}]   ;;  %s1477_s6 = inlined_call_operand.vmem [shape: f32[1,128], index: 6, kind: input, shape index: {}]   ;;  %s1478_s7 = inlined_call_operand.hbm [shape: f32[2,128], index: 7, kind: output, shape index: {}]  }
   0x1   :  { %v1104_v0 = vld [vmem:[%s1472_s1 + $0x38] sm:$0xff]  ;;  %v1103_v4 = vld [vmem:[%s1472_s1 + $0x30] sm:$0xff]  ;;  %v1102_v8 = vld [vmem:[%s1472_s1 + $0x28] sm:$0xff] }
   0x2   :  { %v1112_v1 = vld [vmem:[%s1472_s1 + $0x78] sm:$0xff]  ;;  %566 = vmatpush.bf16.msra.mxu0 %v1104_v0  ;;  %v1111_v5 = vld [vmem:[%s1472_s1 + $0x70] sm:$0xff]  ;;  %v1110_v9 = vld [vmem:[%s1472_s1 + $0x68] sm:$0xff] }
   0x3   :  { %v1120_v2 = vld [vmem:[%s1472_s1 + $0xb8] sm:$0xff]  ;;  %579 = vmatpush.bf16.msra.mxu1 %v1112_v1  ;;  %v1119_v6 = vld [vmem:[%s1472_s1 + $0xb0] sm:$0xff]  ;;  %v1118_v10 = vld [vmem:[%s1472_s1 + $0xa8] sm:$0xff] }
   0x4   :  { %v1128_v3 = vld [vmem:[%s1472_s1 + $0xf8] sm:$0xff]  ;;  %592 = vmatpush.bf16.msra.mxu2 %v1120_v2  ;;  %v1127_v7 = vld [vmem:[%s1472_s1 + $0xf0] sm:$0xff]  ;;  %v1126_v11 = vld [vmem:[%s1472_s1 + $0xe8] sm:$0xff] }
   0x5   :  { %605 = vmatpush.bf16.msra.mxu3 %v1128_v3  ;;  %v1101_v12 = vld [vmem:[%s1472_s1 + $0x20] sm:$0xff]  ;;  %v1100_v17 = vld [vmem:[%s1472_s1 + $0x18] sm:$0xff]  ;;  %v1099_v21 = vld [vmem:[%s1472_s1 + $0x10] sm:$0xff] }
   0x6   :  { %567 = vmatpush.bf16.msra.mxu0 %v1103_v4  ;;  %v1109_v13 = vld [vmem:[%s1472_s1 + $0x60] sm:$0xff]  ;;  %v1108_v18 = vld [vmem:[%s1472_s1 + $0x58] sm:$0xff]  ;;  %v1107_v22 = vld [vmem:[%s1472_s1 + $0x50] sm:$0xff] }
   0x7   :  { %580 = vmatpush.bf16.msra.mxu1 %v1111_v5  ;;  %v1117_v14 = vld [vmem:[%s1472_s1 + $0xa0] sm:$0xff]  ;;  %v1116_v19 = vld [vmem:[%s1472_s1 + $0x98] sm:$0xff]  ;;  %v1115_v23 = vld [vmem:[%s1472_s1 + $0x90] sm:$0xff] }
   0x8   :  { %593 = vmatpush.bf16.msra.mxu2 %v1119_v6  ;;  %v1125_v15 = vld [vmem:[%s1472_s1 + $0xe0] sm:$0xff]  ;;  %v1124_v20 = vld [vmem:[%s1472_s1 + $0xd8] sm:$0xff]  ;;  %v1123_v24 = vld [vmem:[%s1472_s1 + $0xd0] sm:$0xff] }
   0x9   :  { %606 = vmatpush.bf16.msra.mxu3 %v1127_v7  ;;  %v34_v16 = vld [vmem:[%s1471_s0] sm:$0xff] }
   0xa   :  { %568 = vmatpush.bf16.msra.mxu0 %v1102_v8  ;;  %165 = vst [vmem:[#allocation1] ss:$9 sm:$0xff] %v34_v16 }
   0xb   :  { %581 = vmatpush.bf16.msra.mxu1 %v1110_v9 }
   0xc   :  { %594 = vmatpush.bf16.msra.mxu2 %v1118_v10 }
   0xd   :  { %607 = vmatpush.bf16.msra.mxu3 %v1126_v11 }
   0xe   :  { %569 = vmatpush.bf16.msra.mxu0 %v1101_v12 }
   0xf   :  { %582 = vmatpush.bf16.msra.mxu1 %v1109_v13 }
  0x10   :  { %595 = vmatpush.bf16.msra.mxu2 %v1117_v14 }
  0x11   :  { %608 = vmatpush.bf16.msra.mxu3 %v1125_v15 }
  0x12   :  { %570 = vmatpush.bf16.msra.mxu0 %v1100_v17 }
  0x13   :  { %583 = vmatpush.bf16.msra.mxu1 %v1108_v18 }
  0x14   :  { %596 = vmatpush.bf16.msra.mxu2 %v1116_v19 }
  0x15   :  { %609 = vmatpush.bf16.msra.mxu3 %v1124_v20 }
  0x16   :  { %12 = vsyncpa [#allocation4], 0  ;;  %571 = vmatpush.bf16.msra.mxu0 %v1099_v21  ;;  %v1098_v25 = vld [vmem:[%s1472_s1 + $0x8] sm:$0xff]  ;;  %v1097_v29 = vld [vmem:[%s1472_s1] sm:$0xff]  ;;  %vm32_vm0 = vcmask 517120   ;;  %v1202_v11 = vmov 0.0  }
  0x17   :  { %584 = vmatpush.bf16.msra.mxu1 %v1107_v22  ;;  %v1106_v26 = vld [vmem:[%s1472_s1 + $0x48] sm:$0xff]  ;;  %v1105_v30 = vld [vmem:[%s1472_s1 + $0x40] sm:$0xff]  ;;  %v1136_v33 = vld [vmem:[%s1472_s1 + $0x138] sm:$0xff]  ;;  %33 = vst.msk [vmem:[#allocation2] sm:$0x3] %vm32_vm0, %v1202_v11  ;;  %vm721_vm1 = vcmask 523264  }
  0x18   :  { %597 = vmatpush.bf16.msra.mxu2 %v1115_v23  ;;  %v1114_v27 = vld [vmem:[%s1472_s1 + $0x88] sm:$0xff]  ;;  %v1113_v31 = vld [vmem:[%s1472_s1 + $0x80] sm:$0xff]  ;;  %v1144_v34 = vld [vmem:[%s1472_s1 + $0x178] sm:$0xff]  ;;  %vm761_vm2 = vcmask 261120  }
  0x19   :  { %610 = vmatpush.bf16.msra.mxu3 %v1123_v24  ;;  %v1122_v28 = vld [vmem:[%s1472_s1 + $0xc8] sm:$0xff]  ;;  %v1121_v32 = vld [vmem:[%s1472_s1 + $0xc0] sm:$0xff]  ;;  %v1152_v35 = vld [vmem:[%s1472_s1 + $0x1b8] sm:$0xff] }
  0x1a   :  { %572 = vmatpush.bf16.msra.mxu0 %v1098_v25  ;;  %v1160_v36 = vld [vmem:[%s1472_s1 + $0x1f8] sm:$0xff]  ;;  %v1135_v37 = vld [vmem:[%s1472_s1 + $0x130] sm:$0xff]  ;;  %v166_v39 = vld [vmem:[#allocation1] sm:$0xff] }
  0x1b   :  { %585 = vmatpush.bf16.msra.mxu1 %v1106_v26  ;;  %v168_v38 = vld [vmem:[#allocation1 + $0x12] sm:$0xff]  ;;  %v169_v41 = vld [vmem:[#allocation1 + $0x1b] sm:$0xff]  ;;  %v167_v42 = vld [vmem:[#allocation1 + $0x9] sm:$0xff] }
  0x1c   :  { %598 = vmatpush.bf16.msra.mxu2 %v1114_v27  ;;  %v1143_v40 = vld [vmem:[%s1472_s1 + $0x170] sm:$0xff]  ;;  %v1134_v45 = vld [vmem:[%s1472_s1 + $0x128] sm:$0xff]  ;;  %v1133_v49 = vld [vmem:[%s1472_s1 + $0x120] sm:$0xff] }
  0x1d   :  { %611 = vmatpush.bf16.msra.mxu3 %v1122_v28  ;;  %v1151_v43 = vld [vmem:[%s1472_s1 + $0x1b0] sm:$0xff]  ;;  %v1142_v46 = vld [vmem:[%s1472_s1 + $0x168] sm:$0xff]  ;;  %v1141_v50 = vld [vmem:[%s1472_s1 + $0x160] sm:$0xff] }
  0x1e   :  { %573 = vmatpush.bf16.msra.mxu0 %v1097_v29  ;;  %v1159_v44 = vld [vmem:[%s1472_s1 + $0x1f0] sm:$0xff]  ;;  %v1150_v47 = vld [vmem:[%s1472_s1 + $0x1a8] sm:$0xff]  ;;  %v1149_v51 = vld [vmem:[%s1472_s1 + $0x1a0] sm:$0xff] }
  0x1f   :  { %586 = vmatpush.bf16.msra.mxu1 %v1105_v30  ;;  %v1158_v48 = vld [vmem:[%s1472_s1 + $0x1e8] sm:$0xff]  ;;  %v1157_v52 = vld [vmem:[%s1472_s1 + $0x1e0] sm:$0xff]  ;;  %v1132_v53 = vld [vmem:[%s1472_s1 + $0x118] sm:$0xff] }
  0x20   :  { %599 = vmatpush.bf16.msra.mxu2 %v1113_v31  ;;  %v1140_v54 = vld [vmem:[%s1472_s1 + $0x158] sm:$0xff]  ;;  %v1131_v57 = vld [vmem:[%s1472_s1 + $0x110] sm:$0xff]  ;;  %v1130_v61 = vld [vmem:[%s1472_s1 + $0x108] sm:$0xff] }
  0x21   :  { %612 = vmatpush.bf16.msra.mxu3 %v1121_v32  ;;  %574 = vmatmul.bf16.vlgmr.msra.gmra.mxu0 %v166_v39  ;;  %v1148_v55 = vld [vmem:[%s1472_s1 + $0x198] sm:$0xff]  ;;  %v1139_v58 = vld [vmem:[%s1472_s1 + $0x150] sm:$0xff]  ;;  %v1138_v62 = vld [vmem:[%s1472_s1 + $0x148] sm:$0xff] }
  0x22   :  { %618 = vmatpush.bf16.msrb.mxu0 %v1136_v33  ;;  %587 = vmatmul.bf16.vlgmr.msra.gmra.mxu1 %v167_v42  ;;  %v1156_v56 = vld [vmem:[%s1472_s1 + $0x1d8] sm:$0xff]  ;;  %v1147_v59 = vld [vmem:[%s1472_s1 + $0x190] sm:$0xff]  ;;  %v1146_v63 = vld [vmem:[%s1472_s1 + $0x188] sm:$0xff] }
  0x23   :  { %631 = vmatpush.bf16.msrb.mxu1 %v1144_v34  ;;  %600 = vmatmul.bf16.vlgmr.msra.gmra.mxu2 %v168_v38  ;;  %v1155_v60 = vld [vmem:[%s1472_s1 + $0x1d0] sm:$0xff]  ;;  %v1154_v0 = vld [vmem:[%s1472_s1 + $0x1c8] sm:$0xff]  ;;  %v1129_v1 = vld [vmem:[%s1472_s1 + $0x100] sm:$0xff] }
  0x24   :  { %644 = vmatpush.bf16.msrb.mxu2 %v1152_v35  ;;  %613 = vmatmul.bf16.vlgmr.msra.gmra.mxu3 %v169_v41  ;;  %v1137_v2 = vld [vmem:[%s1472_s1 + $0x140] sm:$0xff]  ;;  %v171_v6 = vld [vmem:[#allocation1 + $0x2d] sm:$0xff]  ;;  %v172_v7 = vld [vmem:[#allocation1 + $0x36] sm:$0xff] }
  0x25   :  { %657 = vmatpush.bf16.msrb.mxu3 %v1160_v36  ;;  %v1145_v3 = vld [vmem:[%s1472_s1 + $0x180] sm:$0xff]  ;;  %v1164_v16 = vld [vmem:[%s1474_s3 + $0x18] sm:$0xff]  ;;  %v1163_v17 = vld [vmem:[%s1474_s3 + $0x10] sm:$0xff] }
  0x26   :  { %619 = vmatpush.bf16.msrb.mxu0 %v1135_v37  ;;  %v1153_v4 = vld [vmem:[%s1472_s1 + $0x1c0] sm:$0xff]  ;;  %v1162_v20 = vld [vmem:[%s1474_s3 + $0x8] sm:$0xff] }
  0x27   :  { %632 = vmatpush.bf16.msrb.mxu1 %v1143_v40  ;;  %v170_v5 = vld [vmem:[#allocation1 + $0x24] sm:$0xff]  ;;  %v1169_v40 = vld [vmem:[%s1473_s2] ss:$0 sm:$0xff] }
  0x28   :  { %645 = vmatpush.bf16.msrb.mxu2 %v1151_v43  ;;  %v173_v8 = vld [vmem:[#allocation1 + $0x3f] sm:$0xff]  ;;  %v1166_v24 = vld [vmem:[%s1476_s5 + $0x8] sm:$0xff] }
  0x29   :  { %658 = vmatpush.bf16.msrb.mxu3 %v1159_v44  ;;  %v1161_v21 = vld [vmem:[%s1474_s3] sm:$0xff]  ;;  %v35_v35 = vld [vmem:[#allocation2] sm:$0x3] }
  0x2a   :  { %620 = vmatpush.bf16.msrb.mxu0 %v1134_v45 }
  0x2b   :  { %633 = vmatpush.bf16.msrb.mxu1 %v1142_v46  ;;  %v1165_v46 = vld [vmem:[%s1476_s5] sm:$0xff] }
  0x2c   :  { %646 = vmatpush.bf16.msrb.mxu2 %v1150_v47  ;;  %v1170_v47 = vld [vmem:[%s1475_s4] ss:$0 sm:$0xff]  ;;  %s1203_s4 = smov [#allocation3]  }
  0x2d   :  { %659 = vmatpush.bf16.msrb.mxu3 %v1158_v48  ;;  %s803_s5 = sshll.u32 %s1203_s4, 4  ;;  %s804_s5 = int_to_ptr.vmem [resolvable:$true] %s803_s5 }
  0x2e   :  { %621 = vmatpush.bf16.msrb.mxu0 %v1133_v49 }
  0x2f   :  { %634 = vmatpush.bf16.msrb.mxu1 %v1141_v50 }
  0x30   :  { %647 = vmatpush.bf16.msrb.mxu2 %v1149_v51 }
  0x31   :  { %660 = vmatpush.bf16.msrb.mxu3 %v1157_v52 }
  0x32   :  { %622 = vmatpush.bf16.msrb.mxu0 %v1132_v53 }
  0x33   :  { %635 = vmatpush.bf16.msrb.mxu1 %v1140_v54  ;;  %v1171_v54 = vld [vmem:[%s1477_s6] ss:$0 sm:$0xff]  ;;  %s805_s6 = sshll.u32 %s1478_s7, 4  ;;  %s806_s6 = int_to_ptr.hbm [resolvable:$true] %s805_s6 }
  0x34   :  { %648 = vmatpush.bf16.msrb.mxu2 %v1148_v55 }
  0x35   :  { %661 = vmatpush.bf16.msrb.mxu3 %v1156_v56 }
  0x36   :  { %623 = vmatpush.bf16.msrb.mxu0 %v1131_v57 }
  0x37   :  { %636 = vmatpush.bf16.msrb.mxu1 %v1139_v58 }
  0x38   :  { %649 = vmatpush.bf16.msrb.mxu2 %v1147_v59 }
  0x39   :  { %662 = vmatpush.bf16.msrb.mxu3 %v1155_v60 }
  0x3a   :  { %624 = vmatpush.bf16.msrb.mxu0 %v1130_v61 }
  0x3b   :  { %637 = vmatpush.bf16.msrb.mxu1 %v1138_v62 }
  0x3c   :  { %650 = vmatpush.bf16.msrb.mxu2 %v1146_v63 }
  0x3d   :  { %663 = vmatpush.bf16.msrb.mxu3 %v1154_v0 }
  0x3e   :  { %625 = vmatpush.bf16.msrb.mxu0 %v1129_v1 }
  0x3f   :  { %638 = vmatpush.bf16.msrb.mxu1 %v1137_v2 }
  0x40   :  { %651 = vmatpush.bf16.msrb.mxu2 %v1145_v3 }
  0x41   :  { %664 = vmatpush.bf16.msrb.mxu3 %v1153_v4  ;;  %626 = vmatmul.bf16.vlgmr.msrb.gmra.mxu0 %v170_v5 }
  0x42   :  { %639 = vmatmul.bf16.vlgmr.msrb.gmra.mxu1 %v171_v6  ;;  %729 = vmatpush.bf16.msra.mxu0 %v1164_v16 }
  0x43   :  { %652 = vmatmul.bf16.vlgmr.msrb.gmra.mxu2 %v172_v7  ;;  %771 = vmatpush.bf16.msra.mxu1 %v1166_v24 }
  0x44   :  { %665 = vmatmul.bf16.vlgmr.msrb.gmra.mxu3 %v173_v8 }
  0x46   :  { %730 = vmatpush.bf16.msra.mxu0 %v1163_v17 }
  0x47   :  { %772 = vmatpush.bf16.msra.mxu1 %v1165_v46 }
  0x4a   :  { %731 = vmatpush.bf16.msra.mxu0 %v1162_v20 }
  0x4e   :  { %732 = vmatpush.bf16.msra.mxu0 %v1161_v21 }
  0x9e   :  { %v575_v9 = vpop.f32.mrf.mxu0 }
  0x9f   :  { %v588_v10 = vpop.f32.mrf.mxu1 }
  0xa0   :  { %v589_v22 = vadd.f32 %v588_v10, %v575_v9 }
  0xa6   :  { %v601_v12 = vpop.f32.mrf.mxu2  ;;  %v577_v14 = vpop.f32.mrf.mxu0 }
  0xa7   :  { %v614_v13 = vpop.f32.mrf.mxu3  ;;  %v590_v15 = vpop.f32.mrf.mxu1  ;;  %v602_v23 = vadd.f32 %v601_v12, %v589_v22 }
  0xa9   :  { %v615_v25 = vadd.f32 %v614_v13, %v602_v23 }
  0xae   :  { %v603_v18 = vpop.f32.mrf.mxu2 }
  0xaf   :  { %v616_v19 = vpop.f32.mrf.mxu3 }
  0xbe   :  { %v627_v26 = vpop.f32.mrf.mxu0 }
  0xbf   :  { %v640_v27 = vpop.f32.mrf.mxu1  ;;  %v628_v28 = vadd.f32 %v627_v26, %v615_v25 }
  0xc1   :  { %v641_v29 = vadd.f32 %v640_v27, %v628_v28 }
  0xc6   :  { %v653_v30 = vpop.f32.mrf.mxu2  ;;  %v629_v33 = vpop.f32.mrf.mxu0 }
  0xc7   :  { %v666_v31 = vpop.f32.mrf.mxu3  ;;  %v654_v32 = vadd.f32 %v653_v30, %v641_v29  ;;  %v642_v34 = vpop.f32.mrf.mxu1 }
  0xc9   :  { %v667_v36 = vadd.f32 %v666_v31, %v654_v32 }
  0xcb   :  { %v670_v37 = vadd.f32 %v667_v36, %v35_v35 }
  0xcd   :  { %672 = vst.msk [vmem:[#allocation2] sm:$0x3] %vm32_vm0, %v670_v37 }
  0xce   :  { %v655_v38 = vpop.f32.mrf.mxu2 }
  0xcf   :  { %v668_v39 = vpop.f32.mrf.mxu3 }
  0xd4   :  { %v676_v41 = vld [vmem:[#allocation2] sm:$0x3] }
  0xd5   :  { %v681_v42 = vadd.f32 %v1169_v40, %v676_v41 }
  0xd7   :  { %v682_v43 = vmul.f32 0.2, %v681_v42 }
  0xd9   :  { %v683_v44 = vmax.f32 %v681_v42, %v682_v43 }
  0xdb   :  { %v684_v45 = vpack.c.bf16 %v683_v44, %v683_v44 }
  0xdd   :  { %1086 = vmatmul.msk.bf16.vlgmr.msra.gmra.mxu0 %vm721_vm1, %v684_v45 }
 0x15a   :  { %v734_v48 = vpop.f32.mrf.mxu0 }
 0x15b   :  { %v735_v49 = vadd.f32 %v1170_v47, %v734_v48 }
 0x15d   :  { %v738_v50 = vmul.f32 0.2, %v735_v49 }
 0x15f   :  { %v739_v51 = vmax.f32 %v735_v49, %v738_v50 }
 0x161   :  { %v740_v52 = vpack.c.bf16 %v739_v51, %v739_v51 }
 0x162   :  { %v736_v53 = vpop.f32.mrf.mxu0 }
 0x163   :  { %1095 = vmatmul.msk.bf16.vlgmr.msra.gmra.mxu1 %vm761_vm2, %v740_v52 }
 0x1e0   :  { %v774_v55 = vpop.f32.mrf.mxu1 }
 0x1e1   :  { %v775_v56 = vadd.f32 %v1171_v54, %v774_v55 }
 0x1e3   :  { %v1096_v57 = vmul.f32 -1.442695, %v775_v56 }
 0x1e5   :  { %1172 = vpow2.f32 %v1096_v57 }
 0x1e8   :  { %v776_v58 = vpop.f32.mrf.mxu1 }
 0x1eb   :  { %v1173_v59 = vpop.eup %1172 }
 0x1ec   :  { %v781_v60 = vadd.f32 1.0, %v1173_v59 }
 0x1ee   :  { %1174 = vrcp.f32 %v781_v60  ;;  %v793_v0 = vand.u32 2147483648, %v781_v60  ;;  %v791_v2 = vand.u32 2147483647, %v781_v60  ;;  %vm787_vm4 = vweird.f32 %v781_v60 }
 0x1f0   :  { %v794_v4 = vor.u32 1.1754944e-38, %v793_v0  ;;  %vm792_vm6 = vcmp.eq.f32.partialorder %v791_v2, 8.507059e+37 }
 0x1f4   :  { %v1175_v61 = vpop.eup %1174 }
 0x1f5   :  { %v783_v62 = vmul.f32 %v1175_v61, %v781_v60  ;;  %vm788_vm3 = vweird.f32 %v1175_v61 }
 0x1f6   :  { %vm789_vm5 = vmor %vm787_vm4, %vm788_vm3 }
 0x1f7   :  { %v784_v63 = vsub.f32 1.0, %v783_v62 }
 0x1f9   :  { %v785_v1 = vmul.f32 %v1175_v61, %v784_v63 }
 0x1fb   :  { %v786_v3 = vadd.f32 %v1175_v61, %v785_v1 }
 0x1fd   :  { %v790_v5 = vsel %vm789_vm5, %v1175_v61, %v786_v3 }
 0x1fe   :  { %v795_v6 = vsel %vm792_vm6, %v794_v4, %v790_v5 }
 0x1ff   :  { %797 = vst [vmem:[#allocation3] sm:$0x3] %v795_v6 }
 0x200   :  { %808 = dma.vmem_to_hbm [thread:$0]  %s804_s5, 32, %s806_s6, [#allocation4]  }
 0x201   :  { %1200 = dma.done.wait [#allocation4], 32  }
 0x202   :  { %1201 = vsyncadd [#allocation4], 4294967264 }
 0x203   :  { %813 = vsyncpa [#allocation4], 1 }

// kernel: tpu_custom_call.1
= control target key start
LH: loop header
LB: loop body
LE: loop exit
PB: predicated region body
PF: predicated region fallthrough
CT: control target
= control target key end

     0   :  { %s1471_s0 = inlined_call_operand.vmem [shape: bf16[2,1024], index: 0, kind: input, shape index: {}]   ;;  %s1472_s1 = inlined_call_operand.vmem [shape: bf16[1024,64], index: 1, kind: input, shape index: {}]   ;;  %s1473_s2 = inlined_call_operand.vmem [shape: f32[1,64], index: 2, kind: input, shape index: {}]   ;;  %s1474_s3 = inlined_call_operand.vmem [shape: bf16[64,32], index: 3, kind: input, shape index: {}]   ;;  %s1475_s4 = inlined_call_operand.vmem [shape: f32[1,32], index: 4, kind: input, shape index: {}]   ;;  %s1476_s5 = inlined_call_operand.vmem [shape: bf16[32,128], index: 5, kind: input, shape index: {}]   ;;  %s1477_s6 = inlined_call_operand.vmem [shape: f32[1,128], index: 6, kind: input, shape index: {}]   ;;  %s1478_s7 = inlined_call_operand.hbm [shape: f32[2,128], index: 7, kind: output, shape index: {}]  }
   0x1   :  { %v1104_v0 = vld [vmem:[%s1472_s1 + $0x38] sm:$0xff]  ;;  %v1103_v4 = vld [vmem:[%s1472_s1 + $0x30] sm:$0xff]  ;;  %v1102_v8 = vld [vmem:[%s1472_s1 + $0x28] sm:$0xff] }
   0x2   :  { %v1112_v1 = vld [vmem:[%s1472_s1 + $0x78] sm:$0xff]  ;;  %566 = vmatpush.bf16.msra.mxu0 %v1104_v0  ;;  %v1111_v5 = vld [vmem:[%s1472_s1 + $0x70] sm:$0xff]  ;;  %v1110_v9 = vld [vmem:[%s1472_s1 + $0x68] sm:$0xff] }
   0x3   :  { %v1120_v2 = vld [vmem:[%s1472_s1 + $0xb8] sm:$0xff]  ;;  %579 = vmatpush.bf16.msra.mxu1 %v1112_v1  ;;  %v1119_v6 = vld [vmem:[%s1472_s1 + $0xb0] sm:$0xff]  ;;  %v1118_v10 = vld [vmem:[%s1472_s1 + $0xa8] sm:$0xff] }
   0x4   :  { %v1128_v3 = vld [vmem:[%s1472_s1 + $0xf8] sm:$0xff]  ;;  %592 = vmatpush.bf16.msra.mxu2 %v1120_v2  ;;  %v1127_v7 = vld [vmem:[%s1472_s1 + $0xf0] sm:$0xff]  ;;  %v1126_v11 = vld [vmem:[%s1472_s1 + $0xe8] sm:$0xff] }
   0x5   :  { %605 = vmatpush.bf16.msra.mxu3 %v1128_v3  ;;  %v1101_v12 = vld [vmem:[%s1472_s1 + $0x20] sm:$0xff]  ;;  %v1100_v17 = vld [vmem:[%s1472_s1 + $0x18] sm:$0xff]  ;;  %v1099_v21 = vld [vmem:[%s1472_s1 + $0x10] sm:$0xff] }
   0x6   :  { %567 = vmatpush.bf16.msra.mxu0 %v1103_v4  ;;  %v1109_v13 = vld [vmem:[%s1472_s1 + $0x60] sm:$0xff]  ;;  %v1108_v18 = vld [vmem:[%s1472_s1 + $0x58] sm:$0xff]  ;;  %v1107_v22 = vld [vmem:[%s1472_s1 + $0x50] sm:$0xff] }
   0x7   :  { %580 = vmatpush.bf16.msra.mxu1 %v1111_v5  ;;  %v1117_v14 = vld [vmem:[%s1472_s1 + $0xa0] sm:$0xff]  ;;  %v1116_v19 = vld [vmem:[%s1472_s1 + $0x98] sm:$0xff]  ;;  %v1115_v23 = vld [vmem:[%s1472_s1 + $0x90] sm:$0xff] }
   0x8   :  { %593 = vmatpush.bf16.msra.mxu2 %v1119_v6  ;;  %v1125_v15 = vld [vmem:[%s1472_s1 + $0xe0] sm:$0xff]  ;;  %v1124_v20 = vld [vmem:[%s1472_s1 + $0xd8] sm:$0xff]  ;;  %v1123_v24 = vld [vmem:[%s1472_s1 + $0xd0] sm:$0xff] }
   0x9   :  { %606 = vmatpush.bf16.msra.mxu3 %v1127_v7  ;;  %v34_v16 = vld [vmem:[%s1471_s0] sm:$0xff] }
   0xa   :  { %568 = vmatpush.bf16.msra.mxu0 %v1102_v8  ;;  %165 = vst [vmem:[#allocation1] ss:$9 sm:$0xff] %v34_v16 }
   0xb   :  { %581 = vmatpush.bf16.msra.mxu1 %v1110_v9 }
   0xc   :  { %594 = vmatpush.bf16.msra.mxu2 %v1118_v10 }
   0xd   :  { %607 = vmatpush.bf16.msra.mxu3 %v1126_v11 }
   0xe   :  { %569 = vmatpush.bf16.msra.mxu0 %v1101_v12 }
   0xf   :  { %582 = vmatpush.bf16.msra.mxu1 %v1109_v13 }
  0x10   :  { %595 = vmatpush.bf16.msra.mxu2 %v1117_v14 }
  0x11   :  { %608 = vmatpush.bf16.msra.mxu3 %v1125_v15 }
  0x12   :  { %570 = vmatpush.bf16.msra.mxu0 %v1100_v17 }
  0x13   :  { %583 = vmatpush.bf16.msra.mxu1 %v1108_v18 }
  0x14   :  { %596 = vmatpush.bf16.msra.mxu2 %v1116_v19 }
  0x15   :  { %609 = vmatpush.bf16.msra.mxu3 %v1124_v20 }
  0x16   :  { %12 = vsyncpa [#allocation4], 0  ;;  %571 = vmatpush.bf16.msra.mxu0 %v1099_v21  ;;  %v1098_v25 = vld [vmem:[%s1472_s1 + $0x8] sm:$0xff]  ;;  %v1097_v29 = vld [vmem:[%s1472_s1] sm:$0xff]  ;;  %vm32_vm0 = vcmask 517120   ;;  %v1202_v11 = vmov 0.0  }
  0x17   :  { %584 = vmatpush.bf16.msra.mxu1 %v1107_v22  ;;  %v1106_v26 = vld [vmem:[%s1472_s1 + $0x48] sm:$0xff]  ;;  %v1105_v30 = vld [vmem:[%s1472_s1 + $0x40] sm:$0xff]  ;;  %v1136_v33 = vld [vmem:[%s1472_s1 + $0x138] sm:$0xff]  ;;  %33 = vst.msk [vmem:[#allocation2] sm:$0x3] %vm32_vm0, %v1202_v11  ;;  %vm721_vm1 = vcmask 523264  }
  0x18   :  { %597 = vmatpush.bf16.msra.mxu2 %v1115_v23  ;;  %v1114_v27 = vld [vmem:[%s1472_s1 + $0x88] sm:$0xff]  ;;  %v1113_v31 = vld [vmem:[%s1472_s1 + $0x80] sm:$0xff]  ;;  %v1144_v34 = vld [vmem:[%s1472_s1 + $0x178] sm:$0xff]  ;;  %vm761_vm2 = vcmask 261120  }
  0x19   :  { %610 = vmatpush.bf16.msra.mxu3 %v1123_v24  ;;  %v1122_v28 = vld [vmem:[%s1472_s1 + $0xc8] sm:$0xff]  ;;  %v1121_v32 = vld [vmem:[%s1472_s1 + $0xc0] sm:$0xff]  ;;  %v1152_v35 = vld [vmem:[%s1472_s1 + $0x1b8] sm:$0xff] }
  0x1a   :  { %572 = vmatpush.bf16.msra.mxu0 %v1098_v25  ;;  %v1160_v36 = vld [vmem:[%s1472_s1 + $0x1f8] sm:$0xff]  ;;  %v1135_v37 = vld [vmem:[%s1472_s1 + $0x130] sm:$0xff]  ;;  %v166_v39 = vld [vmem:[#allocation1] sm:$0xff] }
  0x1b   :  { %585 = vmatpush.bf16.msra.mxu1 %v1106_v26  ;;  %v168_v38 = vld [vmem:[#allocation1 + $0x12] sm:$0xff]  ;;  %v169_v41 = vld [vmem:[#allocation1 + $0x1b] sm:$0xff]  ;;  %v167_v42 = vld [vmem:[#allocation1 + $0x9] sm:$0xff] }
  0x1c   :  { %598 = vmatpush.bf16.msra.mxu2 %v1114_v27  ;;  %v1143_v40 = vld [vmem:[%s1472_s1 + $0x170] sm:$0xff]  ;;  %v1134_v45 = vld [vmem:[%s1472_s1 + $0x128] sm:$0xff]  ;;  %v1133_v49 = vld [vmem:[%s1472_s1 + $0x120] sm:$0xff] }
  0x1d   :  { %611 = vmatpush.bf16.msra.mxu3 %v1122_v28  ;;  %v1151_v43 = vld [vmem:[%s1472_s1 + $0x1b0] sm:$0xff]  ;;  %v1142_v46 = vld [vmem:[%s1472_s1 + $0x168] sm:$0xff]  ;;  %v1141_v50 = vld [vmem:[%s1472_s1 + $0x160] sm:$0xff] }
  0x1e   :  { %573 = vmatpush.bf16.msra.mxu0 %v1097_v29  ;;  %v1159_v44 = vld [vmem:[%s1472_s1 + $0x1f0] sm:$0xff]  ;;  %v1150_v47 = vld [vmem:[%s1472_s1 + $0x1a8] sm:$0xff]  ;;  %v1149_v51 = vld [vmem:[%s1472_s1 + $0x1a0] sm:$0xff] }
  0x1f   :  { %586 = vmatpush.bf16.msra.mxu1 %v1105_v30  ;;  %v1158_v48 = vld [vmem:[%s1472_s1 + $0x1e8] sm:$0xff]  ;;  %v1157_v52 = vld [vmem:[%s1472_s1 + $0x1e0] sm:$0xff]  ;;  %v1132_v53 = vld [vmem:[%s1472_s1 + $0x118] sm:$0xff] }
  0x20   :  { %599 = vmatpush.bf16.msra.mxu2 %v1113_v31  ;;  %v1140_v54 = vld [vmem:[%s1472_s1 + $0x158] sm:$0xff]  ;;  %v1131_v57 = vld [vmem:[%s1472_s1 + $0x110] sm:$0xff]  ;;  %v1130_v61 = vld [vmem:[%s1472_s1 + $0x108] sm:$0xff] }
  0x21   :  { %612 = vmatpush.bf16.msra.mxu3 %v1121_v32  ;;  %574 = vmatmul.bf16.vlgmr.msra.gmra.mxu0 %v166_v39  ;;  %v1148_v55 = vld [vmem:[%s1472_s1 + $0x198] sm:$0xff]  ;;  %v1139_v58 = vld [vmem:[%s1472_s1 + $0x150] sm:$0xff]  ;;  %v1138_v62 = vld [vmem:[%s1472_s1 + $0x148] sm:$0xff] }
  0x22   :  { %618 = vmatpush.bf16.msrb.mxu0 %v1136_v33  ;;  %587 = vmatmul.bf16.vlgmr.msra.gmra.mxu1 %v167_v42  ;;  %v1156_v56 = vld [vmem:[%s1472_s1 + $0x1d8] sm:$0xff]  ;;  %v1147_v59 = vld [vmem:[%s1472_s1 + $0x190] sm:$0xff]  ;;  %v1146_v63 = vld [vmem:[%s1472_s1 + $0x188] sm:$0xff] }
  0x23   :  { %631 = vmatpush.bf16.msrb.mxu1 %v1144_v34  ;;  %600 = vmatmul.bf16.vlgmr.msra.gmra.mxu2 %v168_v38  ;;  %v1155_v60 = vld [vmem:[%s1472_s1 + $0x1d0] sm:$0xff]  ;;  %v1154_v0 = vld [vmem:[%s1472_s1 + $0x1c8] sm:$0xff]  ;;  %v1129_v1 = vld [vmem:[%s1472_s1 + $0x100] sm:$0xff] }
  0x24   :  { %644 = vmatpush.bf16.msrb.mxu2 %v1152_v35  ;;  %613 = vmatmul.bf16.vlgmr.msra.gmra.mxu3 %v169_v41  ;;  %v1137_v2 = vld [vmem:[%s1472_s1 + $0x140] sm:$0xff]  ;;  %v171_v6 = vld [vmem:[#allocation1 + $0x2d] sm:$0xff]  ;;  %v172_v7 = vld [vmem:[#allocation1 + $0x36] sm:$0xff] }
  0x25   :  { %657 = vmatpush.bf16.msrb.mxu3 %v1160_v36  ;;  %v1145_v3 = vld [vmem:[%s1472_s1 + $0x180] sm:$0xff]  ;;  %v1164_v16 = vld [vmem:[%s1474_s3 + $0x18] sm:$0xff]  ;;  %v1163_v17 = vld [vmem:[%s1474_s3 + $0x10] sm:$0xff] }
  0x26   :  { %619 = vmatpush.bf16.msrb.mxu0 %v1135_v37  ;;  %v1153_v4 = vld [vmem:[%s1472_s1 + $0x1c0] sm:$0xff]  ;;  %v1162_v20 = vld [vmem:[%s1474_s3 + $0x8] sm:$0xff] }
  0x27   :  { %632 = vmatpush.bf16.msrb.mxu1 %v1143_v40  ;;  %v170_v5 = vld [vmem:[#allocation1 + $0x24] sm:$0xff]  ;;  %v1169_v40 = vld [vmem:[%s1473_s2] ss:$0 sm:$0xff] }
  0x28   :  { %645 = vmatpush.bf16.msrb.mxu2 %v1151_v43  ;;  %v173_v8 = vld [vmem:[#allocation1 + $0x3f] sm:$0xff]  ;;  %v1166_v24 = vld [vmem:[%s1476_s5 + $0x8] sm:$0xff] }
  0x29   :  { %658 = vmatpush.bf16.msrb.mxu3 %v1159_v44  ;;  %v1161_v21 = vld [vmem:[%s1474_s3] sm:$0xff]  ;;  %v35_v35 = vld [vmem:[#allocation2] sm:$0x3] }
  0x2a   :  { %620 = vmatpush.bf16.msrb.mxu0 %v1134_v45 }
  0x2b   :  { %633 = vmatpush.bf16.msrb.mxu1 %v1142_v46  ;;  %v1165_v46 = vld [vmem:[%s1476_s5] sm:$0xff] }
  0x2c   :  { %646 = vmatpush.bf16.msrb.mxu2 %v1150_v47  ;;  %v1170_v47 = vld [vmem:[%s1475_s4] ss:$0 sm:$0xff]  ;;  %s1203_s4 = smov [#allocation3]  }
  0x2d   :  { %659 = vmatpush.bf16.msrb.mxu3 %v1158_v48  ;;  %s803_s5 = sshll.u32 %s1203_s4, 4  ;;  %s804_s5 = int_to_ptr.vmem [resolvable:$true] %s803_s5 }
  0x2e   :  { %621 = vmatpush.bf16.msrb.mxu0 %v1133_v49 }
  0x2f   :  { %634 = vmatpush.bf16.msrb.mxu1 %v1141_v50 }
  0x30   :  { %647 = vmatpush.bf16.msrb.mxu2 %v1149_v51 }
  0x31   :  { %660 = vmatpush.bf16.msrb.mxu3 %v1157_v52 }
  0x32   :  { %622 = vmatpush.bf16.msrb.mxu0 %v1132_v53 }
  0x33   :  { %635 = vmatpush.bf16.msrb.mxu1 %v1140_v54  ;;  %v1171_v54 = vld [vmem:[%s1477_s6] ss:$0 sm:$0xff]  ;;  %s805_s6 = sshll.u32 %s1478_s7, 4  ;;  %s806_s6 = int_to_ptr.hbm [resolvable:$true] %s805_s6 }
  0x34   :  { %648 = vmatpush.bf16.msrb.mxu2 %v1148_v55 }
  0x35   :  { %661 = vmatpush.bf16.msrb.mxu3 %v1156_v56 }
  0x36   :  { %623 = vmatpush.bf16.msrb.mxu0 %v1131_v57 }
  0x37   :  { %636 = vmatpush.bf16.msrb.mxu1 %v1139_v58 }
  0x38   :  { %649 = vmatpush.bf16.msrb.mxu2 %v1147_v59 }
  0x39   :  { %662 = vmatpush.bf16.msrb.mxu3 %v1155_v60 }
  0x3a   :  { %624 = vmatpush.bf16.msrb.mxu0 %v1130_v61 }
  0x3b   :  { %637 = vmatpush.bf16.msrb.mxu1 %v1138_v62 }
  0x3c   :  { %650 = vmatpush.bf16.msrb.mxu2 %v1146_v63 }
  0x3d   :  { %663 = vmatpush.bf16.msrb.mxu3 %v1154_v0 }
  0x3e   :  { %625 = vmatpush.bf16.msrb.mxu0 %v1129_v1 }
  0x3f   :  { %638 = vmatpush.bf16.msrb.mxu1 %v1137_v2 }
  0x40   :  { %651 = vmatpush.bf16.msrb.mxu2 %v1145_v3 }
  0x41   :  { %664 = vmatpush.bf16.msrb.mxu3 %v1153_v4  ;;  %626 = vmatmul.bf16.vlgmr.msrb.gmra.mxu0 %v170_v5 }
  0x42   :  { %639 = vmatmul.bf16.vlgmr.msrb.gmra.mxu1 %v171_v6  ;;  %729 = vmatpush.bf16.msra.mxu0 %v1164_v16 }
  0x43   :  { %652 = vmatmul.bf16.vlgmr.msrb.gmra.mxu2 %v172_v7  ;;  %771 = vmatpush.bf16.msra.mxu1 %v1166_v24 }
  0x44   :  { %665 = vmatmul.bf16.vlgmr.msrb.gmra.mxu3 %v173_v8 }
  0x46   :  { %730 = vmatpush.bf16.msra.mxu0 %v1163_v17 }
  0x47   :  { %772 = vmatpush.bf16.msra.mxu1 %v1165_v46 }
  0x4a   :  { %731 = vmatpush.bf16.msra.mxu0 %v1162_v20 }
  0x4e   :  { %732 = vmatpush.bf16.msra.mxu0 %v1161_v21 }
  0x9e   :  { %v575_v9 = vpop.f32.mrf.mxu0 }
  0x9f   :  { %v588_v10 = vpop.f32.mrf.mxu1 }
  0xa0   :  { %v589_v22 = vadd.f32 %v588_v10, %v575_v9 }
  0xa6   :  { %v601_v12 = vpop.f32.mrf.mxu2  ;;  %v577_v14 = vpop.f32.mrf.mxu0 }
  0xa7   :  { %v614_v13 = vpop.f32.mrf.mxu3  ;;  %v590_v15 = vpop.f32.mrf.mxu1  ;;  %v602_v23 = vadd.f32 %v601_v12, %v589_v22 }
  0xa9   :  { %v615_v25 = vadd.f32 %v614_v13, %v602_v23 }
  0xae   :  { %v603_v18 = vpop.f32.mrf.mxu2 }
  0xaf   :  { %v616_v19 = vpop.f32.mrf.mxu3 }
  0xbe   :  { %v627_v26 = vpop.f32.mrf.mxu0 }
  0xbf   :  { %v640_v27 = vpop.f32.mrf.mxu1  ;;  %v628_v28 = vadd.f32 %v627_v26, %v615_v25 }
  0xc1   :  { %v641_v29 = vadd.f32 %v640_v27, %v628_v28 }
  0xc6   :  { %v653_v30 = vpop.f32.mrf.mxu2  ;;  %v629_v33 = vpop.f32.mrf.mxu0 }
  0xc7   :  { %v666_v31 = vpop.f32.mrf.mxu3  ;;  %v654_v32 = vadd.f32 %v653_v30, %v641_v29  ;;  %v642_v34 = vpop.f32.mrf.mxu1 }
  0xc9   :  { %v667_v36 = vadd.f32 %v666_v31, %v654_v32 }
  0xcb   :  { %v670_v37 = vadd.f32 %v667_v36, %v35_v35 }
  0xcd   :  { %672 = vst.msk [vmem:[#allocation2] sm:$0x3] %vm32_vm0, %v670_v37 }
  0xce   :  { %v655_v38 = vpop.f32.mrf.mxu2 }
  0xcf   :  { %v668_v39 = vpop.f32.mrf.mxu3 }
  0xd4   :  { %v676_v41 = vld [vmem:[#allocation2] sm:$0x3] }
  0xd5   :  { %v681_v42 = vadd.f32 %v1169_v40, %v676_v41 }
  0xd7   :  { %v682_v43 = vmul.f32 0.2, %v681_v42 }
  0xd9   :  { %v683_v44 = vmax.f32 %v681_v42, %v682_v43 }
  0xdb   :  { %v684_v45 = vpack.c.bf16 %v683_v44, %v683_v44 }
  0xdd   :  { %1086 = vmatmul.msk.bf16.vlgmr.msra.gmra.mxu0 %vm721_vm1, %v684_v45 }
 0x15a   :  { %v734_v48 = vpop.f32.mrf.mxu0 }
 0x15b   :  { %v735_v49 = vadd.f32 %v1170_v47, %v734_v48 }
 0x15d   :  { %v738_v50 = vmul.f32 0.2, %v735_v49 }
 0x15f   :  { %v739_v51 = vmax.f32 %v735_v49, %v738_v50 }
 0x161   :  { %v740_v52 = vpack.c.bf16 %v739_v51, %v739_v51 }
 0x162   :  { %v736_v53 = vpop.f32.mrf.mxu0 }
 0x163   :  { %1095 = vmatmul.msk.bf16.vlgmr.msra.gmra.mxu1 %vm761_vm2, %v740_v52 }
 0x1e0   :  { %v774_v55 = vpop.f32.mrf.mxu1 }
 0x1e1   :  { %v775_v56 = vadd.f32 %v1171_v54, %v774_v55 }
 0x1e3   :  { %v1096_v57 = vmul.f32 -1.442695, %v775_v56 }
 0x1e5   :  { %1172 = vpow2.f32 %v1096_v57 }
 0x1e8   :  { %v776_v58 = vpop.f32.mrf.mxu1 }
 0x1eb   :  { %v1173_v59 = vpop.eup %1172 }
 0x1ec   :  { %v781_v60 = vadd.f32 1.0, %v1173_v59 }
 0x1ee   :  { %1174 = vrcp.f32 %v781_v60  ;;  %v793_v0 = vand.u32 2147483648, %v781_v60  ;;  %v791_v2 = vand.u32 2147483647, %v781_v60  ;;  %vm787_vm4 = vweird.f32 %v781_v60 }
 0x1f0   :  { %v794_v4 = vor.u32 1.1754944e-38, %v793_v0  ;;  %vm792_vm6 = vcmp.eq.f32.partialorder %v791_v2, 8.507059e+37 }
 0x1f4   :  { %v1175_v61 = vpop.eup %1174 }
 0x1f5   :  { %v783_v62 = vmul.f32 %v1175_v61, %v781_v60  ;;  %vm788_vm3 = vweird.f32 %v1175_v61 }
 0x1f6   :  { %vm789_vm5 = vmor %vm787_vm4, %vm788_vm3 }
 0x1f7   :  { %v784_v63 = vsub.f32 1.0, %v783_v62 }
 0x1f9   :  { %v785_v1 = vmul.f32 %v1175_v61, %v784_v63 }
 0x1fb   :  { %v786_v3 = vadd.f32 %v1175_v61, %v785_v1 }
 0x1fd   :  { %v790_v5 = vsel %vm789_vm5, %v1175_v61, %v786_v3 }
 0x1fe   :  { %v795_v6 = vsel %vm792_vm6, %v794_v4, %v790_v5 }
 0x1ff   :  { %797 = vst [vmem:[#allocation3] sm:$0x3] %v795_v6 }
 0x200   :  { %808 = dma.vmem_to_hbm [thread:$0]  %s804_s5, 32, %s806_s6, [#allocation4]  }
 0x201   :  { %1200 = dma.done.wait [#allocation4], 32  }
 0x202   :  { %1201 = vsyncadd [#allocation4], 4294967264 }
 0x203   :  { %813 = vsyncpa [#allocation4], 1 }

</bundles_post_ra>
